<compile_context>
chip_gen: v7x
topology: tpu7x:2x2x1
jax: 0.10.0
libtpu: 0.0.40
codegen_flags: <defaults>
</compile_context>

<pallas_src>
import functools
import math

import jax
import jax.numpy as jnp
import numpy as np
from jax.experimental import pallas as pl
from jax.experimental.pallas import tpu as pltpu


def _dsconv_kernel(x_ref, mask_ref, w_ref, bias_ref, o_ref, *, offs):
    # x_ref   : (NB*C, Lp)          NB batch elements x C channels as packed rows,
    #                               spatial flattened into the lane axis
    # mask_ref: (KT, Lp) f32        per-tap in-image indicator (in-kernel zero padding)
    # w_ref   : (NB*Cout, KT*NB*C)  fused depthwise+pointwise weights (block-diag over NB)
    # bias_ref: (NB*Cout, 1)        fused bias: Wpw @ b_dw + b_pw, tiled over NB
    # o_ref   : (NB*Cout, Lp)
    Lp = x_ref.shape[-1]
    xv = x_ref[...].astype(jnp.float32)          # loaded once, fully packed rows
    masks = mask_ref[...]                        # (KT, Lp)

    # Masked, lane-shifted taps.  Rolls run on the XLU; the only VPU work per tap is one
    # mask multiply.  Rolls act per row, so rows (batch/channel) can never contaminate
    # each other; masked taps never read wrapped or pad lanes.
    taps = []
    for t, off in enumerate(offs):
        shift = (-off) % Lp                      # static lane offset of this tap
        r = pltpu.roll(xv, shift, axis=1) if shift else xv
        taps.append(r * masks[t:t + 1, :])

    # Tap accumulation + pointwise 1x1 conv as ONE MXU matmul (K = KT*NB*C, f32 acc).
    # Concat pieces are whole (NB*C)-row blocks (multiples of 8 rows in the common case),
    # so stacking is tile-aligned.
    staged = jnp.concatenate(taps, axis=0)       # (KT*NB*C, Lp)
    y = jnp.dot(w_ref[...].astype(jnp.float32), staged,
                preferred_element_type=jnp.float32)
    o_ref[...] = (y + bias_ref[...].astype(jnp.float32)).astype(o_ref.dtype)


def _pick_batch_block(N, C, Cout, KT, Lp, itemsize):
    """Number of batch elements folded into one grid step.

    Goals: (a) NB*C >= 8 so packed rows fill all vreg sublanes, (b) block row counts are
    multiples of 8 or cover the whole array (BlockSpec tiling rule), (c) per-step VMEM
    footprint stays well under v7x's 64 MiB so double-buffered blocks keep headroom,
    (d) keep as many grid steps as possible for pipelining.
    """
    divisors = [d for d in range(1, N + 1) if N % d == 0]
    valid = [d for d in divisors
             if ((d * C) % 8 == 0 and (d * Cout) % 8 == 0) or d == N]

    def vmem_bytes(nb):
        blk_in = nb * C * Lp * itemsize
        blk_out = nb * Cout * Lp * itemsize
        staged = (KT + 1) * nb * C * Lp * 4            # taps + staged concat (f32)
        return 2 * (blk_in + blk_out) + staged         # in/out double-buffered

    budget = 24 * 1024 * 1024                          # v7x-friendly block budget
    for d in valid:                                    # smallest first -> most grid steps
        if d * C >= 8 and vmem_bytes(d) <= budget:
            return d
    fitting = [d for d in valid if vmem_bytes(d) <= budget]
    return fitting[-1] if fitting else valid[0]


def depthwise_separable_conv2d(x_nchw, w_dw, b_dw, w_pw, b_pw, *, padding):
    """x_nchw: (N, C, H, W). w_dw: (C, 1, KH, KW). b_dw: (C,). w_pw: (Cout, C, 1, 1).
    b_pw: (Cout,). stride=1, dilation=1, padding_mode='zeros' (module defaults except
    kernel_size/padding, which are constructor hyperparameters)."""
    N, C, H, W = x_nchw.shape
    KH, KW = int(w_dw.shape[2]), int(w_dw.shape[3])
    Cout = int(w_pw.shape[0])
    ph = pw = int(padding)
    Ho = H + 2 * ph - (KH - 1)
    Wo = W + 2 * pw - (KW - 1)
    KT = KH * KW

    if 2 * ph <= KH - 1 and 2 * pw <= KW - 1:
        # Output grid fits inside the input grid -> padding handled fully in-kernel by
        # the mask table; wrapper touches x with pure reshapes only.
        xs, Hg, Wg, ph_k, pw_k = x_nchw, H, W, ph, pw
    else:
        # TODO(synk): padding > 'same' needs an output grid larger than the input grid;
        # fall back to a wrapper-side jnp.pad (one extra HBM read+write of the input).
        xs = jnp.pad(x_nchw, ((0, 0), (0, 0), (ph, ph), (pw, pw)))
        Hg, Wg, ph_k, pw_k = H + 2 * ph, W + 2 * pw, 0, 0

    L = Hg * Wg
    Lp = ((L + 127) // 128) * 128                      # lane-dense width (mult of 128)
    x2d = xs.reshape(N * C, L)                         # pure reshape, no data movement
    if Lp != L:                                        # only when H*W is not 128-aligned
        x2d = jnp.pad(x2d, ((0, 0), (0, Lp - L)))

    # Per-tap lane offsets and in-image masks, built once on the host.
    lane = np.arange(Lp)
    hh, ww = lane // Wg, lane % Wg                     # lanes >= L get hh >= Hg -> mask 0
    offs, mask_rows = [], []
    for kh in range(KH):
        for kw in range(KW):
            dh, dw = kh - ph_k, kw - pw_k
            offs.append(dh * Wg + dw)
            mask_rows.append(((hh + dh >= 0) & (hh + dh < Hg) &
                              (ww + dw >= 0) & (ww + dw < Wg)).astype(np.float32))
    mask_tbl = jnp.asarray(np.stack(mask_rows, axis=0))            # (KT, Lp)

    NB = _pick_batch_block(N, C, Cout, KT, Lp, jnp.dtype(x_nchw.dtype).itemsize)

    # Fused weights: W[n*Cout+o, t*NB*C+n'*C+c] = [n==n'] * w_pw[o,c] * w_dw[c,t]
    # (block-diagonal over the NB batch elements that share one block).
    wdw = w_dw.reshape(C, KT).astype(jnp.float32)                  # (C, KT)
    wpwT = w_pw[:, :, 0, 0].astype(jnp.float32)                    # (Cout, C)
    wf = wpwT[:, None, :] * wdw.T[None, :, :]                      # (Cout, KT, C)
    eye = jnp.eye(NB, dtype=jnp.float32)
    wbig = jnp.einsum('ab,otc->aotbc', eye, wf).reshape(NB * Cout, KT * NB * C)
    bias = wpwT @ b_dw.astype(jnp.float32) + b_pw.astype(jnp.float32)   # fold dw bias
    bias_big = jnp.tile(bias.reshape(1, Cout), (NB, 1)).reshape(NB * Cout, 1)

    out2d = pl.pallas_call(
        functools.partial(_dsconv_kernel, offs=tuple(offs)),
        out_shape=jax.ShapeDtypeStruct((N * Cout, Lp), x_nchw.dtype),
        grid=(N // NB,),
        in_specs=[
            pl.BlockSpec((NB * C, Lp), lambda b: (b, 0)),
            pl.BlockSpec((KT, Lp), lambda b: (0, 0)),
            pl.BlockSpec((NB * Cout, KT * NB * C), lambda b: (0, 0)),
            pl.BlockSpec((NB * Cout, 1), lambda b: (0, 0)),
        ],
        out_specs=pl.BlockSpec((NB * Cout, Lp), lambda b: (b, 0)),
        compiler_params=pltpu.CompilerParams(
            dimension_semantics=("parallel",),
        ),
    )(x2d, mask_tbl, wbig, bias_big)

    # Discard pad lanes [L, Lp) (garbage by design), then trim to the true output size.
    out = out2d.reshape(N, Cout, Lp)[:, :, :L].reshape(N, Cout, Hg, Wg)
    if (Ho, Wo) != (Hg, Wg):
        out = out[:, :, :Ho, :Wo]
    return out


def _reference(x_nchw, w_dw, b_dw, w_pw, b_pw, *, padding):
    # pure-JAX reference using lax.conv_general_dilated (matches nn.Conv2d semantics)
    C = x_nchw.shape[1]
    y = jax.lax.conv_general_dilated(
        x_nchw, w_dw, window_strides=(1, 1),
        padding=((padding, padding), (padding, padding)),
        dimension_numbers=("NCHW", "OIHW", "NCHW"),
        feature_group_count=C)
    y = y + b_dw.reshape(1, -1, 1, 1)
    z = jax.lax.conv_general_dilated(
        y, w_pw, window_strides=(1, 1), padding="VALID",
        dimension_numbers=("NCHW", "OIHW", "NCHW"))
    return z + b_pw.reshape(1, -1, 1, 1)


if __name__ == "__main__":
    # hyperparameters of the module instance
    N, Cin, Cout, H, W = 2, 4, 8, 16, 16
    KH = KW = 3
    padding = 1

    key = jax.random.PRNGKey(0)
    kx, k1, k2, k3, k4 = jax.random.split(key, 5)

    x = jax.random.normal(kx, (N, Cin, H, W), dtype=jnp.float32)

    # deterministic variance-scaling-style init (fan_in, normal) for the two convs,
    # plus small non-zero biases to exercise the fused-bias path
    std_dw = math.sqrt(1.0 / max(1.0, 1 * KH * KW))            # depthwise: fan_in = 1*KH*KW
    w_dw = std_dw * jax.random.normal(k1, (Cin, 1, KH, KW), dtype=jnp.float32)
    b_dw = 0.1 * jax.random.normal(k3, (Cin,), dtype=jnp.float32)
    std_pw = math.sqrt(1.0 / max(1.0, Cin * 1 * 1))            # pointwise: fan_in = Cin
    w_pw = std_pw * jax.random.normal(k2, (Cout, Cin, 1, 1), dtype=jnp.float32)
    b_pw = 0.1 * jax.random.normal(k4, (Cout,), dtype=jnp.float32)

    out = depthwise_separable_conv2d(x, w_dw, b_dw, w_pw, b_pw, padding=padding)
    out = jax.block_until_ready(out)

    ref = _reference(x, w_dw, b_dw, w_pw, b_pw, padding=padding)
    assert out.shape == (N, Cout, H, W)
    assert jnp.allclose(out, ref, atol=1e-5, rtol=1e-5)
    print("KERNEL_OK")
</pallas_src>

<mosaic_0001>
module attributes {stable_mosaic.version = 11 : i64} {
  func.func @_dsconv_kernel(%arg0: i32, %arg1: memref<8x256xf32, #tpu.memory_space<vmem>>, %arg2: memref<9x256xf32, #tpu.memory_space<vmem>>, %arg3: memref<16x72xf32, #tpu.memory_space<vmem>>, %arg4: memref<16x1xf32, #tpu.memory_space<vmem>>, %arg5: memref<16x256xf32, #tpu.memory_space<vmem>>) attributes {dimension_semantics = [#tpu.dimension_semantics<parallel>], iteration_bounds = array<i64: 1>, scalar_prefetch = 0 : i64, scratch_operands = 0 : i64, tpu.core_type = #tpu.core_type<tc>, window_params = [{transform_indices = @transform_0, window_bounds = array<i64: 8, 256>}, {pipeline_mode = #tpu.pipeline_mode<synchronous>, transform_indices = @transform_1, window_bounds = array<i64: 9, 256>}, {pipeline_mode = #tpu.pipeline_mode<synchronous>, transform_indices = @transform_2, window_bounds = array<i64: 16, 72>}, {pipeline_mode = #tpu.pipeline_mode<synchronous>, transform_indices = @transform_3, window_bounds = array<i64: 16, 1>}, {transform_indices = @transform_4, window_bounds = array<i64: 16, 256>}]} {
    %c0 = arith.constant 0 : index
    %c0_0 = arith.constant 0 : index
    %0 = vector.load %arg1[%c0, %c0_0] : memref<8x256xf32, #tpu.memory_space<vmem>>, vector<8x256xf32>
    %c0_1 = arith.constant 0 : index
    %c0_2 = arith.constant 0 : index
    %1 = vector.load %arg2[%c0_1, %c0_2] : memref<9x256xf32, #tpu.memory_space<vmem>>, vector<9x256xf32>
    %c17_i32 = arith.constant 17 : i32
    %2 = tpu.dynamic_rotate %0 by %c17_i32 dim 1 : vector<8x256xf32>, i32 -> vector<8x256xf32>
    %3 = vector.extract_strided_slice %1 {offsets = [0, 0], sizes = [1, 256], strides = [1, 1]} : vector<9x256xf32> to vector<1x256xf32>
    %4 = vector.broadcast %3 : vector<1x256xf32> to vector<8x256xf32>
    %5 = arith.mulf %2, %4 : vector<8x256xf32>
    %c16_i32 = arith.constant 16 : i32
    %6 = tpu.dynamic_rotate %0 by %c16_i32 dim 1 : vector<8x256xf32>, i32 -> vector<8x256xf32>
    %7 = vector.extract_strided_slice %1 {offsets = [1, 0], sizes = [1, 256], strides = [1, 1]} : vector<9x256xf32> to vector<1x256xf32>
    %8 = vector.broadcast %7 : vector<1x256xf32> to vector<8x256xf32>
    %9 = arith.mulf %6, %8 : vector<8x256xf32>
    %c15_i32 = arith.constant 15 : i32
    %10 = tpu.dynamic_rotate %0 by %c15_i32 dim 1 : vector<8x256xf32>, i32 -> vector<8x256xf32>
    %11 = vector.extract_strided_slice %1 {offsets = [2, 0], sizes = [1, 256], strides = [1, 1]} : vector<9x256xf32> to vector<1x256xf32>
    %12 = vector.broadcast %11 : vector<1x256xf32> to vector<8x256xf32>
    %13 = arith.mulf %10, %12 : vector<8x256xf32>
    %c1_i32 = arith.constant 1 : i32
    %14 = tpu.dynamic_rotate %0 by %c1_i32 dim 1 : vector<8x256xf32>, i32 -> vector<8x256xf32>
    %15 = vector.extract_strided_slice %1 {offsets = [3, 0], sizes = [1, 256], strides = [1, 1]} : vector<9x256xf32> to vector<1x256xf32>
    %16 = vector.broadcast %15 : vector<1x256xf32> to vector<8x256xf32>
    %17 = arith.mulf %14, %16 : vector<8x256xf32>
    %18 = vector.extract_strided_slice %1 {offsets = [4, 0], sizes = [1, 256], strides = [1, 1]} : vector<9x256xf32> to vector<1x256xf32>
    %19 = vector.broadcast %18 : vector<1x256xf32> to vector<8x256xf32>
    %20 = arith.mulf %0, %19 : vector<8x256xf32>
    %c255_i32 = arith.constant 255 : i32
    %21 = tpu.dynamic_rotate %0 by %c255_i32 dim 1 : vector<8x256xf32>, i32 -> vector<8x256xf32>
    %22 = vector.extract_strided_slice %1 {offsets = [5, 0], sizes = [1, 256], strides = [1, 1]} : vector<9x256xf32> to vector<1x256xf32>
    %23 = vector.broadcast %22 : vector<1x256xf32> to vector<8x256xf32>
    %24 = arith.mulf %21, %23 : vector<8x256xf32>
    %c241_i32 = arith.constant 241 : i32
    %25 = tpu.dynamic_rotate %0 by %c241_i32 dim 1 : vector<8x256xf32>, i32 -> vector<8x256xf32>
    %26 = vector.extract_strided_slice %1 {offsets = [6, 0], sizes = [1, 256], strides = [1, 1]} : vector<9x256xf32> to vector<1x256xf32>
    %27 = vector.broadcast %26 : vector<1x256xf32> to vector<8x256xf32>
    %28 = arith.mulf %25, %27 : vector<8x256xf32>
    %c240_i32 = arith.constant 240 : i32
    %29 = tpu.dynamic_rotate %0 by %c240_i32 dim 1 : vector<8x256xf32>, i32 -> vector<8x256xf32>
    %30 = vector.extract_strided_slice %1 {offsets = [7, 0], sizes = [1, 256], strides = [1, 1]} : vector<9x256xf32> to vector<1x256xf32>
    %31 = vector.broadcast %30 : vector<1x256xf32> to vector<8x256xf32>
    %32 = arith.mulf %29, %31 : vector<8x256xf32>
    %c239_i32 = arith.constant 239 : i32
    %33 = tpu.dynamic_rotate %0 by %c239_i32 dim 1 : vector<8x256xf32>, i32 -> vector<8x256xf32>
    %34 = vector.extract_strided_slice %1 {offsets = [8, 0], sizes = [1, 256], strides = [1, 1]} : vector<9x256xf32> to vector<1x256xf32>
    %35 = vector.broadcast %34 : vector<1x256xf32> to vector<8x256xf32>
    %36 = arith.mulf %33, %35 : vector<8x256xf32>
    %37 = tpu.concatenate %5, %9, %13, %17, %20, %24, %28, %32, %36 in 0 : vector<8x256xf32>, vector<8x256xf32>, vector<8x256xf32>, vector<8x256xf32>, vector<8x256xf32>, vector<8x256xf32>, vector<8x256xf32>, vector<8x256xf32>, vector<8x256xf32> -> vector<72x256xf32>
    %c0_3 = arith.constant 0 : index
    %c0_4 = arith.constant 0 : index
    %38 = vector.load %arg3[%c0_3, %c0_4] : memref<16x72xf32, #tpu.memory_space<vmem>>, vector<16x72xf32>
    %cst = arith.constant dense<0.000000e+00> : vector<16x256xf32>
    %39 = tpu.matmul %38, %37, %cst {dimension_numbers = #tpu.dot_dimension_numbers<[1], [0], [0], [1], [0, 0, 1, 1], [], []>} : vector<16x72xf32>, vector<72x256xf32>, vector<16x256xf32> -> vector<16x256xf32>
    %c0_5 = arith.constant 0 : index
    %c0_6 = arith.constant 0 : index
    %40 = vector.load %arg4[%c0_5, %c0_6] : memref<16x1xf32, #tpu.memory_space<vmem>>, vector<16x1xf32>
    %41 = vector.broadcast %40 : vector<16x1xf32> to vector<16x256xf32>
    %42 = arith.addf %39, %41 : vector<16x256xf32>
    %c0_7 = arith.constant 0 : index
    %c0_8 = arith.constant 0 : index
    %43 = vector.load %arg5[%c0_7, %c0_8] : memref<16x256xf32, #tpu.memory_space<vmem>>, vector<16x256xf32>
    tpu.vector_store %arg5[%c0_7, %c0_8], %42 {strides = array<i32>} : memref<16x256xf32, #tpu.memory_space<vmem>>, vector<16x256xf32>,
    return
  }
  func.func @transform_0(%arg0: i32) -> (i32, i32) {
    %c0_i32 = arith.constant 0 : i32
    %c0_i32_0 = arith.constant 0 : i32
    return %arg0, %c0_i32 : i32, i32
  }
  func.func @transform_1(%arg0: i32) -> (i32, i32) {
    %c0_i32 = arith.constant 0 : i32
    %c0_i32_0 = arith.constant 0 : i32
    %c0_i32_1 = arith.constant 0 : i32
    return %c0_i32, %c0_i32_0 : i32, i32
  }
  func.func @transform_2(%arg0: i32) -> (i32, i32) {
    %c0_i32 = arith.constant 0 : i32
    %c0_i32_0 = arith.constant 0 : i32
    %c0_i32_1 = arith.constant 0 : i32
    return %c0_i32, %c0_i32_0 : i32, i32
  }
  func.func @transform_3(%arg0: i32) -> (i32, i32) {
    %c0_i32 = arith.constant 0 : i32
    %c0_i32_0 = arith.constant 0 : i32
    %c0_i32_1 = arith.constant 0 : i32
    return %c0_i32, %c0_i32_0 : i32, i32
  }
  func.func @transform_4(%arg0: i32) -> (i32, i32) {
    %c0_i32 = arith.constant 0 : i32
    %c0_i32_0 = arith.constant 0 : i32
    return %arg0, %c0_i32 : i32, i32
  }
}

</mosaic_0001>

<bundles_post_ra>
// kernel: tpu_custom_call.1
= control target key start
LH: loop header
LB: loop body
LE: loop exit
PB: predicated region body
PF: predicated region fallthrough
CT: control target
= control target key end

     0   :  { %9 = vsyncpa [#allocation3], 0  ;;  %s603_s0 = inlined_call_operand.vmem [shape: f32[8,256], index: 0, kind: input, shape index: {}]   ;;  %s604_s1 = inlined_call_operand.hbm [shape: f32[9,256], index: 1, kind: input, shape index: {}]   ;;  %s605_s2 = inlined_call_operand.hbm [shape: f32[16,72], index: 2, kind: input, shape index: {}]   ;;  %s606_s3 = inlined_call_operand.vmem [shape: f32[16,1], index: 3, kind: input, shape index: {}]   ;;  %s607_s4 = inlined_call_operand.hbm [shape: f32[16,256], index: 4, kind: output, shape index: {}]  }
   0x1   :  { %10 = vsyncpa [#allocation6], 0 }
   0x2   :  { %11 = vsyncpa [#allocation4], 0  ;;  %s440_s15 = smov [#allocation2]   ;;  %s368_s19 = scalar_lea.hbm %s604_s1, 512 }
   0x3   :  { %s19_s16 = sshll.u32 %s440_s15, 4  ;;  %p369_p0 = scmp.ne.s32.totalorder %s604_s1, %s368_s19  ;;  %s20_s16 = int_to_ptr.vmem [resolvable:$true] %s19_s16 }
   0x4   :  { %p372_p1 = scmp.lt.u32.totalorder %s368_s19, %s604_s1 }
   0x6   :  { %p374_p2 = pnand %p372_p1, %p369_p0 }
   0x8   :  { %377 = shalt.err (!%p374_p2)
}
   0x9   :  { %s378_s24 = scalar_lea.vmem %s20_s16, 512  ;;  %p383_p4 = scmp.lt.s32.totalorder %s20_s16, %s20_s16 }
   0xa   :  { %p379_p3 = scmp.ne.s32.totalorder %s20_s16, %s378_s24  ;;  %p384_p5 = scmp.lt.s32.totalorder %s378_s24, %s378_s24 }
   0xc   :  { %p385_p6 = por %p384_p5, %p383_p4 }
   0xe   :  { %p386_p7 = pnand %p385_p6, %p379_p3 }
  0x10   :  { %389 = shalt.err (!%p386_p7)
}
  0x11   :  { %s441_s25 = smov 256   ;;  %s442_s26 = smov 16  }
  0x12   :  { %25 = dma.hbm_to_vmem [thread:$0]  %s604_s1, 512, %s20_s16, [#allocation3], %s441_s25, %s441_s25, %s442_s26  }
  0x13   :  { %s443_s29 = smov [#allocation5]   ;;  %s390_s7 = scalar_lea.hbm %s605_s2, 256 }
  0x14   :  { %s31_s30 = sshll.u32 %s443_s29, 4  ;;  %p391_p8 = scmp.ne.s32.totalorder %s605_s2, %s390_s7  ;;  %s32_s30 = int_to_ptr.vmem [resolvable:$true] %s31_s30 }
  0x15   :  { %p394_p9 = scmp.lt.u32.totalorder %s390_s7, %s605_s2 }
  0x17   :  { %p396_p10 = pnand %p394_p9, %p391_p8 }
  0x19   :  { %399 = shalt.err (!%p396_p10)
}
  0x1a   :  { %s400_s12 = scalar_lea.vmem %s32_s30, 256  ;;  %p405_p12 = scmp.lt.s32.totalorder %s32_s30, %s32_s30 }
  0x1b   :  { %p401_p11 = scmp.ne.s32.totalorder %s32_s30, %s400_s12  ;;  %p406_p13 = scmp.lt.s32.totalorder %s400_s12, %s400_s12 }
  0x1d   :  { %p407_p0 = por %p406_p13, %p405_p12 }
  0x1f   :  { %p408_p1 = pnand %p407_p0, %p401_p11 }
  0x21   :  { %411 = shalt.err (!%p408_p1)
}
  0x22   :  { %s444_s1 = smov 128   ;;  %s445_s13 = smov 8  }
  0x23   :  { %37 = dma.hbm_to_vmem [thread:$0]  %s605_s2, 256, %s32_s30, [#allocation6], %s444_s1, %s444_s1, %s445_s13  }
  0x24   :  { %434 = dma.done.wait [#allocation3], 512  }
  0x25   :  { %435 = vsyncadd [#allocation3], 4294966784 }
  0x26   :  { %436 = dma.done.wait [#allocation6], 256  }
  0x27   :  { %437 = vsyncadd [#allocation6], 4294967040  ;;  %v511_v0 = vld [vmem:[%s603_s0] sm:$0xff]  ;;  %s446_s18 = smov 17   ;;  %v519_v1 = vld [vmem:[%s603_s0 + $0x8] sm:$0xff]  ;;  %s447_s2 = smov 15   ;;  %v56_v6 = vlaneseq }
  0x28   :  { %71 = vrot.lane.b32.xlu1 %v511_v0, %s442_s26  ;;  %52 = vrot.lane.b32.xlu0 %v511_v0, %s446_s18  ;;  %s448_s21 = smov 1   ;;  %s449_s22 = smov 127   ;;  %v451_v2 = vmov 0.0   ;;  %v452_v3 = vmov 0   ;;  %v203_v4 = vld [vmem:[%s606_s3 + $0x8] sm:$0xff]  ;;  %v202_v5 = vld [vmem:[%s606_s3] sm:$0xff] }
  0x29   :  { %s450_s0 = smov 113   ;;  %285 = vmatprep.mubr.f32.mxu0 %v451_v2  ;;  %291 = vmatprep.mubr.f32.mxu1 %v451_v2  ;;  %s453_s23 = smov 112   ;;  %v542_v7 = vshrl.u32 %v56_v6, 7  ;;  %v544_v8 = vand.u32 127, %v56_v6  ;;  %v548_v11 = vld [vmem:[#allocation2] sm:$0xff]  ;;  %v550_v12 = vld [vmem:[#allocation2 + $0x8] sm:$0xff] }
  0x2a   :  { %367 = vset.pattern.permute.xlu1 %v452_v3  ;;  %366 = vset.pattern.permute.xlu0 %v452_v3  ;;  %s454_s24 = smov 111   ;;  %vm214_vm8 = vcmask 588800   ;;  %s455_s3 = smov [#allocation7]  }
  0x2b   :  { %v80_v9 = vsub.s32 1, %v542_v7  ;;  %v63_v10 = vsub.s32 0, %v542_v7  ;;  %vm75_vm0 = vcmp.lt.s32.totalorder %v544_v8, 16  ;;  %vm58_vm1 = vcmp.lt.s32.totalorder %v544_v8, 17  ;;  %s307_s5 = sshll.u32 %s455_s3, 4  ;;  %s308_s5 = int_to_ptr.vmem [resolvable:$true] %s307_s5 }
  0x2c   :  { %73 = vrot.lane.b32.xlu1 %v519_v1, %s442_s26  ;;  %54 = vrot.lane.b32.xlu0 %v519_v1, %s446_s18  ;;  %v97_v21 = vsub.s32 2, %v542_v7  ;;  %v114_v22 = vsub.s32 3, %v542_v7  ;;  %vm92_vm2 = vcmp.lt.s32.totalorder %v544_v8, 15  ;;  %v124_v35 = vsub.s32 4, %v542_v7  ;;  %s412_s6 = scalar_lea.vmem %s308_s5, 512  ;;  %p417_p3 = scmp.lt.s32.totalorder %s308_s5, %s308_s5 }
  0x2d   :  { %v81_v15 = vrot.slane %v548_v11, %v80_v9  ;;  %v85_v16 = vrot.slane %v550_v12, %v80_v9  ;;  %v64_v17 = vrot.slane %v548_v11, %v63_v10  ;;  %v68_v18 = vrot.slane %v550_v12, %v63_v10  ;;  %p413_p2 = scmp.ne.s32.totalorder %s308_s5, %s412_s6  ;;  %p418_p4 = scmp.lt.s32.totalorder %s412_s6, %s412_s6 }
  0x2e   :  { %v98_v36 = vrot.slane %v548_v11, %v97_v21  ;;  %v141_v37 = vsub.s32 5, %v542_v7  ;;  %v102_v38 = vrot.slane %v550_v12, %v97_v21  ;;  %vm109_vm3 = vcmp.lt.s32.totalorder %v544_v8, 1 }
  0x2f   :  { %v115_v39 = vrot.slane %v548_v11, %v114_v22  ;;  %v119_v40 = vrot.slane %v550_v12, %v114_v22  ;;  %vm136_vm4 = vcmp.lt.s32.totalorder %v544_v8, 127  ;;  %v129_v45 = vrot.slane %v550_v12, %v124_v35  ;;  %p419_p5 = por %p418_p4, %p417_p3 }
  0x30   :  { %90 = vrot.lane.b32.xlu1 %v519_v1, %s447_s2  ;;  %88 = vrot.lane.b32.xlu0 %v511_v0, %s447_s2  ;;  %v125_v46 = vrot.slane %v548_v11, %v124_v35  ;;  %v142_v49 = vrot.slane %v548_v11, %v141_v37  ;;  %v146_v50 = vrot.slane %v550_v12, %v141_v37  ;;  %v158_v63 = vsub.s32 6, %v542_v7 }
  0x31   :  { %v131_v59 = vmul.f32 %v129_v45, %v519_v1  ;;  %vm153_vm5 = vcmp.lt.s32.totalorder %v544_v8, 113  ;;  %vm170_vm6 = vcmp.lt.s32.totalorder %v544_v8, 112  ;;  %vm187_vm7 = vcmp.lt.s32.totalorder %v544_v8, 111  ;;  %v200_v8 = vld [vmem:[#allocation5] sm:$0xff]  ;;  %p420_p6 = pnand %p419_p5, %p413_p2 }
  0x32   :  { %v130_v60 = vmul.f32 %v125_v46, %v511_v0  ;;  %v159_v9 = vrot.slane %v548_v11, %v158_v63  ;;  %v163_v10 = vrot.slane %v550_v12, %v158_v63 }
  0x34   :  { %107 = vrot.lane.b32.xlu1 %v519_v1, %s448_s21  ;;  %105 = vrot.lane.b32.xlu0 %v511_v0, %s448_s21 }
  0x38   :  { %134 = vrot.lane.b32.xlu1 %v519_v1, %s449_s22  ;;  %132 = vrot.lane.b32.xlu0 %v511_v0, %s449_s22 }
  0x3c   :  { %151 = vrot.lane.b32.xlu1 %v519_v1, %s450_s0  ;;  %149 = vrot.lane.b32.xlu0 %v511_v0, %s450_s0 }
  0x40   :  { %168 = vrot.lane.b32.xlu1 %v519_v1, %s453_s23  ;;  %166 = vrot.lane.b32.xlu0 %v511_v0, %s453_s23 }
  0x44   :  { %185 = vrot.lane.b32.xlu1 %v519_v1, %s454_s24  ;;  %183 = vrot.lane.b32.xlu0 %v511_v0, %s454_s24 }
  0x48   :  { %211 = vperm.xlu1 %367, %v203_v4   ;;  %206 = vperm.xlu0 %366, %v202_v5   ;;  %v175_v4 = vsub.s32 7, %v542_v7 }
  0x4a   :  { %v180_v7 = vrot.slane %v550_v12, %v175_v4 }
  0x9a   :  { %v72_v13 = vpop.permute.xlu1 %71  ;;  %v53_v14 = vpop.permute.xlu0 %52 }
  0x9e   :  { %v74_v19 = vpop.permute.xlu1 %73  ;;  %v55_v20 = vpop.permute.xlu0 %54 }
  0x9f   :  { %v76_v23 = vsel %vm75_vm0, %v72_v13, %v74_v19  ;;  %v77_v24 = vsel %vm75_vm0, %v74_v19, %v72_v13  ;;  %v59_v25 = vsel %vm58_vm1, %v53_v14, %v55_v20  ;;  %v60_v26 = vsel %vm58_vm1, %v55_v20, %v53_v14 }
  0xa0   :  { %v86_v27 = vmul.f32 %v81_v15, %v77_v24  ;;  %v87_v28 = vmul.f32 %v85_v16, %v76_v23  ;;  %v69_v29 = vmul.f32 %v64_v17, %v60_v26  ;;  %v70_v30 = vmul.f32 %v68_v18, %v59_v25  ;;  %v321_v24 = vld [vmem:[#allocation2 + $0x18] ss:$0 sm:$0xff]  ;;  %v320_v26 = vld [vmem:[#allocation2 + $0x10] ss:$0 sm:$0xff] }
  0xa1   :  { %v176_v13 = vrot.slane %v548_v11, %v175_v4 }
  0xa2   :  { %v91_v31 = vpop.permute.xlu1 %90  ;;  %v89_v32 = vpop.permute.xlu0 %88  ;;  %v324_v33 = vpack.c.bf16 %v87_v28, %v70_v30  ;;  %v326_v34 = vpack.c.bf16 %v86_v27, %v69_v29 }
  0xa3   :  { %v93_v41 = vsel %vm92_vm2, %v89_v32, %v91_v31  ;;  %v94_v42 = vsel %vm92_vm2, %v91_v31, %v89_v32  ;;  %v201_v32 = vld [vmem:[#allocation5 + $0x8] sm:$0xff] }
  0xa4   :  { %325 = vmatprep.subr.bf16.mxu0 %v324_v33  ;;  %340 = vmatprep.subr.bf16.mxu1 %v324_v33  ;;  %v103_v51 = vmul.f32 %v98_v36, %v94_v42  ;;  %v104_v52 = vmul.f32 %v102_v38, %v93_v41 }
  0xa5   :  { %327 = vmatpush1.bf16.msra.mxu0 %v326_v34  ;;  %345 = vmatpush1.bf16.msra.mxu1 %v326_v34 }
  0xa6   :  { %v108_v43 = vpop.permute.xlu1 %107  ;;  %v106_v44 = vpop.permute.xlu0 %105 }
  0xa7   :  { %v110_v47 = vsel %vm109_vm3, %v106_v44, %v108_v43  ;;  %v111_v48 = vsel %vm109_vm3, %v108_v43, %v106_v44 }
  0xa8   :  { %v120_v53 = vmul.f32 %v115_v39, %v111_v48  ;;  %v121_v54 = vmul.f32 %v119_v40, %v110_v47 }
  0xaa   :  { %v135_v55 = vpop.permute.xlu1 %134  ;;  %v133_v56 = vpop.permute.xlu0 %132  ;;  %v328_v57 = vpack.c.bf16 %v121_v54, %v104_v52  ;;  %v330_v58 = vpack.c.bf16 %v120_v53, %v103_v51 }
  0xab   :  { %v137_v61 = vsel %vm136_vm4, %v133_v56, %v135_v55  ;;  %v138_v62 = vsel %vm136_vm4, %v135_v55, %v133_v56 }
  0xac   :  { %v147_v2 = vmul.f32 %v142_v49, %v137_v61  ;;  %v148_v3 = vmul.f32 %v146_v50, %v138_v62  ;;  %329 = vmatprep.subr.bf16.mxu0 %v328_v57  ;;  %341 = vmatprep.subr.bf16.mxu1 %v328_v57 }
  0xad   :  { %331 = vmatpush1.bf16.msra.mxu0 %v330_v58  ;;  %346 = vmatpush1.bf16.msra.mxu1 %v330_v58 }
  0xae   :  { %v152_v5 = vpop.permute.xlu1 %151  ;;  %v150_v0 = vpop.permute.xlu0 %149  ;;  %v332_v1 = vpack.c.bf16 %v148_v3, %v131_v59  ;;  %v334_v6 = vpack.c.bf16 %v147_v2, %v130_v60 }
  0xaf   :  { %v154_v14 = vsel %vm153_vm5, %v150_v0, %v152_v5  ;;  %v155_v15 = vsel %vm153_vm5, %v152_v5, %v150_v0 }
  0xb0   :  { %333 = vmatprep.subr.bf16.mxu0 %v332_v1  ;;  %342 = vmatprep.subr.bf16.mxu1 %v332_v1  ;;  %v164_v20 = vmul.f32 %v159_v9, %v154_v14  ;;  %v165_v21 = vmul.f32 %v163_v10, %v155_v15 }
  0xb1   :  { %335 = vmatpush1.bf16.msra.mxu0 %v334_v6  ;;  %347 = vmatpush1.bf16.msra.mxu1 %v334_v6 }
  0xb2   :  { %v169_v16 = vpop.permute.xlu1 %168  ;;  %v167_v17 = vpop.permute.xlu0 %166 }
  0xb3   :  { %v171_v18 = vsel %vm170_vm6, %v167_v17, %v169_v16  ;;  %v172_v19 = vsel %vm170_vm6, %v169_v16, %v167_v17 }
  0xb4   :  { %v181_v22 = vmul.f32 %v176_v13, %v171_v18  ;;  %v182_v23 = vmul.f32 %v180_v7, %v172_v19 }
  0xb6   :  { %v186_v25 = vpop.permute.xlu1 %185  ;;  %v184_v11 = vpop.permute.xlu0 %183  ;;  %v336_v27 = vpack.c.bf16 %v182_v23, %v165_v21  ;;  %v338_v12 = vpack.c.bf16 %v181_v22, %v164_v20 }
  0xb7   :  { %v188_v28 = vsel %vm187_vm7, %v184_v11, %v186_v25  ;;  %v189_v29 = vsel %vm187_vm7, %v186_v25, %v184_v11 }
  0xb8   :  { %v199_v30 = vmul.f32 %v321_v24, %v189_v29  ;;  %337 = vmatprep.subr.bf16.mxu0 %v336_v27  ;;  %343 = vmatprep.subr.bf16.mxu1 %v336_v27  ;;  %v198_v31 = vmul.f32 %v320_v26, %v188_v28 }
  0xb9   :  { %339 = vmatpush1.bf16.msra.mxu0 %v338_v12  ;;  %348 = vmatpush1.bf16.msra.mxu1 %v338_v12 }
  0xba   :  { %237 = vmatprep.subr.mxu0 %v199_v30  ;;  %344 = vmatprep.subr.mxu1 %v199_v30 }
  0xbd   :  { %238 = vmatpush1.msra.mxu0 %v198_v31  ;;  %349 = vmatpush1.msra.mxu1 %v198_v31 }
  0xbe   :  { %322 = vmatmul.mubr.msk.f32.vlgmr.msra.gmra.mrb[0].mxu0 %vm214_vm8, %v200_v8  ;;  %323 = vmatmul.mubr.msk.f32.vlgmr.msra.gmra.mrb[0].mxu1 %vm214_vm8, %v201_v32 }
  0xc7   :  { %v212_v33 = vpop.permute.xlu1 %211  ;;  %v207_v34 = vpop.permute.xlu0 %206 }
 0x191   :  { %v287_v35 = vpop.f32.mrb[0].mxu0  ;;  %v293_v36 = vpop.f32.mrb[0].mxu1 }
 0x192   :  { %v288_v37 = vadd.f32 %v287_v35, %v207_v34  ;;  %v294_v38 = vadd.f32 %v293_v36, %v212_v33  ;;  %v289_v39 = vpop.f32.mrb[1].mxu0  ;;  %v295_v40 = vpop.f32.mrb[1].mxu1 }
 0x193   :  { %v290_v41 = vadd.f32 %v289_v39, %v207_v34  ;;  %v296_v42 = vadd.f32 %v295_v40, %v212_v33 }
 0x194   :  { %298 = vst [vmem:[#allocation7] sm:$0xff] %v288_v37  ;;  %300 = vst [vmem:[#allocation7 + $0x10] sm:$0xff] %v294_v38 }
 0x195   :  { %299 = vst [vmem:[#allocation7 + $0x8] sm:$0xff] %v290_v41  ;;  %301 = vst [vmem:[#allocation7 + $0x18] sm:$0xff] %v296_v42 }
 0x196   :  { %423 = shalt.err (!%p420_p6)
}
 0x197   :  { %s424_s9 = scalar_lea.hbm %s607_s4, 512 }
 0x198   :  { %p425_p7 = scmp.ne.s32.totalorder %s607_s4, %s424_s9  ;;  %p428_p8 = scmp.lt.u32.totalorder %s424_s9, %s607_s4 }
 0x19a   :  { %p430_p9 = pnand %p428_p8, %p425_p7 }
 0x19c   :  { %433 = shalt.err (!%p430_p9)
}
 0x19d   :  { %313 = dma.vmem_to_hbm [thread:$0]  %s308_s5, 512, %s607_s4, [#allocation4], %s441_s25, %s441_s25, %s442_s26  }
 0x19e   :  { %438 = dma.done.wait [#allocation4], 512  }
 0x19f   :  { %439 = vsyncadd [#allocation4], 4294966784 }
 0x1a0   :  { %317 = vsyncpa [#allocation3], 1 }
 0x1a1   :  { %318 = vsyncpa [#allocation6], 1 }
 0x1a2   :  { %319 = vsyncpa [#allocation4], 1 }

</bundles_post_ra>
